<compile_context>
chip_gen: v6e
topology: v6e:2x2x1
jax: 0.10.0
libtpu: 0.0.40
codegen_flags: <defaults>
</compile_context>

<pallas_src>
import jax
import jax.numpy as jnp
from jax.experimental import pallas as pl
from jax.experimental.pallas import tpu as pltpu

HIDDEN = 20


def mlp_kernel(x_ref, w1_ref, b1_ref, w2_ref, b2_ref, o_ref):
    # x_ref:  (F, TB) f32  -- batch on lanes
    # w1_ref: (H, F)  f32  -- torch-native Linear layout (out, in)
    # b1_ref: (H, 1)  f32
    # w2_ref: (H, 1)  f32  -- layer2 weight as a column
    # b2_ref: (1, 1)  f32  -- scalar, in SMEM
    # o_ref:  (1, TB) f32  -- lane-dense output row
    # Layer 1 on the MXU: (H, F) @ (F, TB) -> (H, TB), f32 accumulation.
    h = jnp.dot(w1_ref[...], x_ref[...], preferred_element_type=jnp.float32)
    h = jnp.maximum(h + b1_ref[...], 0.0)              # bias + ReLU on the VPU
    # Layer 2 (20 -> 1): VPU multiply + sublane reduce (XLU) instead of an
    # N=1 MXU pass.
    y = jnp.sum(h * w2_ref[...], axis=0, keepdims=True) + b2_ref[0, 0]
    o_ref[...] = jax.nn.sigmoid(y).astype(o_ref.dtype)


def _round_up(n, m):
    return ((n + m - 1) // m) * m


def simulate_net_forward(x, w1, b1, w2, b2):
    """x: (B, F) f32; w1: (H, F); b1: (H,); w2: (1, H); b2: (1,).  Returns (B, 1)."""
    B, F = x.shape
    H = w1.shape[0]

    # Lane-axis tile: multiple of 128 (lane width).  32768 rows keeps the
    # double-buffered working set ~10 MiB (safe on v7x's 64 MiB VMEM) while
    # giving >=128 KiB contiguous DMA bursts per tile.
    TB = min(32768, _round_up(max(B, 1), 128))
    B_pad = _round_up(B, TB)
    grid = (B_pad // TB,)

    # Single layout pass: transpose so batch maps to lanes, pad the tail.
    # TODO(synk): ideally the upstream producer emits x already as (F, B);
    # this wrapper transpose is layout plumbing, not compute.
    x_t = jnp.pad(x.astype(jnp.float32).T, ((0, 0), (0, B_pad - B)))   # (F, B_pad)

    w1_f = w1.astype(jnp.float32)                       # (H, F)
    b1_col = b1.astype(jnp.float32).reshape(H, 1)       # (H, 1)
    w2_col = w2.astype(jnp.float32).reshape(H, 1)       # (H, 1)
    b2_s = b2.astype(jnp.float32).reshape(1, 1)         # scalar -> SMEM

    cost = pl.CostEstimate(
        flops=2 * B_pad * F * H + 2 * B_pad * H,
        transcendentals=B_pad,                                         # sigmoid exp
        bytes_accessed=(B_pad * F * 4) + (B_pad * 4) + (F * H + 3 * H + 1) * 4,
    )

    out = pl.pallas_call(
        mlp_kernel,
        out_shape=jax.ShapeDtypeStruct((1, B_pad), jnp.float32),
        grid=grid,
        in_specs=[
            pl.BlockSpec((F, TB), lambda i: (0, i)),             # streamed x tiles (lane-dense)
            pl.BlockSpec((H, F), lambda i: (0, 0)),              # resident W1
            pl.BlockSpec((H, 1), lambda i: (0, 0)),              # resident b1 column
            pl.BlockSpec((H, 1), lambda i: (0, 0)),              # resident w2 column
            pl.BlockSpec(memory_space=pltpu.MemorySpace.SMEM),   # b2 scalar
        ],
        out_specs=pl.BlockSpec((1, TB), lambda i: (0, i)),       # lane-dense output row
        compiler_params=pltpu.CompilerParams(
            dimension_semantics=("parallel",),   # shard batch tiles across TCs on v7x
            vmem_limit_bytes=32 * 1024 * 1024,
        ),
        cost_estimate=cost,
    )(x_t, w1_f, b1_col, w2_col, b2_s)

    # Slice padded columns away and restore the (B, 1) module output layout.
    return out[0, :B].reshape(B, 1)


def init_params(key, no_input_features, hidden=HIDDEN):
    """Deterministic init matching torch.nn.Linear defaults:
    U(-1/sqrt(fan_in), 1/sqrt(fan_in)); layer2 weights clamped to [0, 1]."""
    k1, k2, k3, k4 = jax.random.split(key, 4)
    bound1 = 1.0 / jnp.sqrt(jnp.float32(no_input_features))
    bound2 = 1.0 / jnp.sqrt(jnp.float32(hidden))
    # torch-native layouts: weight (out, in), bias (out,)
    w1 = jax.random.uniform(k1, (hidden, no_input_features), jnp.float32,
                            -bound1, bound1)
    b1 = jax.random.uniform(k2, (hidden,), jnp.float32, -bound1, bound1)
    w2 = jax.random.uniform(k3, (1, hidden), jnp.float32, -bound2, bound2)
    # self.layer2.weight.data = torch.clamp(..., 0, 1)
    w2 = jnp.clip(w2, 0.0, 1.0)
    b2 = jax.random.uniform(k4, (1,), jnp.float32, -bound2, bound2)
    return w1, b1, w2, b2


if __name__ == "__main__":
    key = jax.random.PRNGKey(0)
    kx, kp = jax.random.split(key)

    batch = 8
    no_input_features = 10   # Give-Me-Some-Credit style feature count

    x = jax.random.normal(kx, (batch, no_input_features), jnp.float32)
    w1, b1, w2, b2 = init_params(kp, no_input_features)

    y = simulate_net_forward(x, w1, b1, w2, b2)
    y = jax.block_until_ready(y)
    assert y.shape == (batch, 1)

    # Pure-f32 PyTorch-equivalent reference (tolerance covers MXU pass rounding).
    h_ref = jnp.maximum(x @ w1.T + b1, 0.0)
    y_ref = jax.nn.sigmoid(h_ref @ w2.T + b2)
    assert jnp.allclose(y, y_ref, atol=5e-3, rtol=5e-3)

    print("KERNEL_OK")
</pallas_src>

<mosaic_0001>
module attributes {stable_mosaic.version = 11 : i64} {
  func.func @mlp_kernel(%arg0: i32, %arg1: memref<10x128xf32, #tpu.memory_space<vmem>>, %arg2: memref<20x10xf32, #tpu.memory_space<vmem>>, %arg3: memref<20x1xf32, #tpu.memory_space<vmem>>, %arg4: memref<20x1xf32, #tpu.memory_space<vmem>>, %arg5: memref<1x1xf32, #tpu.memory_space<smem>>, %arg6: memref<1x128xf32, #tpu.memory_space<vmem>>) attributes {dimension_semantics = [#tpu.dimension_semantics<parallel>], iteration_bounds = array<i64: 1>, scalar_prefetch = 0 : i64, scratch_operands = 0 : i64, tpu.core_type = #tpu.core_type<tc>, window_params = [{transform_indices = @transform_0, window_bounds = array<i64: 10, 128>}, {pipeline_mode = #tpu.pipeline_mode<synchronous>, transform_indices = @transform_1, window_bounds = array<i64: 20, 10>}, {pipeline_mode = #tpu.pipeline_mode<synchronous>, transform_indices = @transform_2, window_bounds = array<i64: 20, 1>}, {pipeline_mode = #tpu.pipeline_mode<synchronous>, transform_indices = @transform_3, window_bounds = array<i64: 20, 1>}, {transform_indices = @transform_4, window_bounds = array<i64: 1, 1>}, {transform_indices = @transform_5, window_bounds = array<i64: 1, 128>}]} {
    %c0 = arith.constant 0 : index
    %c0_0 = arith.constant 0 : index
    %0 = vector.load %arg2[%c0, %c0_0] : memref<20x10xf32, #tpu.memory_space<vmem>>, vector<20x10xf32>
    %c0_1 = arith.constant 0 : index
    %c0_2 = arith.constant 0 : index
    %1 = vector.load %arg1[%c0_1, %c0_2] : memref<10x128xf32, #tpu.memory_space<vmem>>, vector<10x128xf32>
    %cst = arith.constant dense<0.000000e+00> : vector<20x128xf32>
    %2 = tpu.matmul %0, %1, %cst {dimension_numbers = #tpu.dot_dimension_numbers<[1], [0], [0], [1], [0, 0, 1, 1], [], []>} : vector<20x10xf32>, vector<10x128xf32>, vector<20x128xf32> -> vector<20x128xf32>
    %c0_3 = arith.constant 0 : index
    %c0_4 = arith.constant 0 : index
    %3 = vector.load %arg3[%c0_3, %c0_4] : memref<20x1xf32, #tpu.memory_space<vmem>>, vector<20x1xf32>
    %4 = vector.broadcast %3 : vector<20x1xf32> to vector<20x128xf32>
    %5 = arith.addf %2, %4 : vector<20x128xf32>
    %cst_5 = arith.constant 0.000000e+00 : f32
    %6 = vector.broadcast %cst_5 : f32 to vector<20x128xf32>
    %7 = arith.maximumf %5, %6 : vector<20x128xf32>
    %c0_6 = arith.constant 0 : index
    %c0_7 = arith.constant 0 : index
    %8 = vector.load %arg4[%c0_6, %c0_7] : memref<20x1xf32, #tpu.memory_space<vmem>>, vector<20x1xf32>
    %9 = vector.broadcast %8 : vector<20x1xf32> to vector<20x128xf32>
    %10 = arith.mulf %7, %9 : vector<20x128xf32>
    %cst_8 = arith.constant dense<0.000000e+00> : vector<128xf32>
    %11 = vector.multi_reduction <add>, %10, %cst_8 [0] : vector<20x128xf32> to vector<128xf32>
    %12 = vector.shape_cast %11 : vector<128xf32> to vector<1x128xf32>
    %c0_9 = arith.constant 0 : index
    %c0_10 = arith.constant 0 : index
    %13 = memref.load %arg5[%c0_9, %c0_10] : memref<1x1xf32, #tpu.memory_space<smem>>
    %14 = vector.broadcast %13 : f32 to vector<1x128xf32>
    %15 = arith.addf %12, %14 : vector<1x128xf32>
    %16 = arith.negf %15 : vector<1x128xf32>
    %17 = math.exp %16 : vector<1x128xf32>
    %cst_11 = arith.constant 1.000000e+00 : f32
    %18 = vector.broadcast %cst_11 : f32 to vector<1x128xf32>
    %19 = arith.addf %18, %17 : vector<1x128xf32>
    %20 = arith.divf %18, %19 : vector<1x128xf32>
    %c0_12 = arith.constant 0 : index
    %c0_13 = arith.constant 0 : index
    %21 = vector.load %arg6[%c0_12, %c0_13] : memref<1x128xf32, #tpu.memory_space<vmem>>, vector<1x128xf32>
    tpu.vector_store %arg6[%c0_12, %c0_13], %20 {strides = array<i32>} : memref<1x128xf32, #tpu.memory_space<vmem>>, vector<1x128xf32>,
    return
  }
  func.func @transform_0(%arg0: i32) -> (i32, i32) {
    %c0_i32 = arith.constant 0 : i32
    %c0_i32_0 = arith.constant 0 : i32
    return %c0_i32, %arg0 : i32, i32
  }
  func.func @transform_1(%arg0: i32) -> (i32, i32) {
    %c0_i32 = arith.constant 0 : i32
    %c0_i32_0 = arith.constant 0 : i32
    %c0_i32_1 = arith.constant 0 : i32
    return %c0_i32, %c0_i32_0 : i32, i32
  }
  func.func @transform_2(%arg0: i32) -> (i32, i32) {
    %c0_i32 = arith.constant 0 : i32
    %c0_i32_0 = arith.constant 0 : i32
    %c0_i32_1 = arith.constant 0 : i32
    return %c0_i32, %c0_i32_0 : i32, i32
  }
  func.func @transform_3(%arg0: i32) -> (i32, i32) {
    %c0_i32 = arith.constant 0 : i32
    %c0_i32_0 = arith.constant 0 : i32
    %c0_i32_1 = arith.constant 0 : i32
    return %c0_i32, %c0_i32_0 : i32, i32
  }
  func.func @transform_4(%arg0: i32) -> (i32, i32) {
    %c0_i32 = arith.constant 0 : i32
    %c0_i32_0 = arith.constant 0 : i32
    %c0_i32_1 = arith.constant 0 : i32
    return %c0_i32, %c0_i32_0 : i32, i32
  }
  func.func @transform_5(%arg0: i32) -> (i32, i32) {
    %c0_i32 = arith.constant 0 : i32
    %c0_i32_0 = arith.constant 0 : i32
    return %c0_i32, %arg0 : i32, i32
  }
}

</mosaic_0001>

<bundles_post_ra>
// kernel: tpu_custom_call.1
= control target key start
LH: loop header
LB: loop body
LE: loop exit
PB: predicated region body
PF: predicated region fallthrough
CT: control target
= control target key end

     0   :  { %vm55_vm0 = vcmask 1041408   ;;  %v256_v1 = vmov 0.0   ;;  %vm45_vm1 = vcmask 80896   ;;  %s332_s0 = inlined_call_operand.vmem [shape: f32[10,128], index: 0, kind: input, shape index: {}]   ;;  %s333_s1 = inlined_call_operand.vmem [shape: f32[20,10], index: 1, kind: input, shape index: {}]   ;;  %s334_s2 = inlined_call_operand.vmem [shape: f32[20,1], index: 2, kind: input, shape index: {}]   ;;  %s335_s3 = inlined_call_operand.vmem [shape: f32[20,1], index: 3, kind: input, shape index: {}]   ;;  %s336_s4 = inlined_call_operand.<no memory space> [shape: f32[1,1], index: 4, kind: input, shape index: {}]   ;;  %s337_s5 = inlined_call_operand.hbm [shape: f32[1,128], index: 5, kind: output, shape index: {}]  }
   0x1   :  { %v26_v0 = vld [vmem:[%s332_s0 + $0x8] sm:$0x3]  ;;  %207 = vmatprep.subr.mxu0 %v256_v1  ;;  %220 = vmatprep.subr.mxu1 %v256_v1  ;;  %v25_v2 = vld [vmem:[%s332_s0] sm:$0xff] }
   0x2   :  { %208 = vmatpush3.msk.msra.mxu0 %vm55_vm0, %v26_v0  ;;  %222 = vmatpush3.msk.msra.mxu1 %vm55_vm0, %v26_v0  ;;  %v22_v3 = vld [vmem:[%s333_s1] sm:$0xff]  ;;  %v23_v4 = vld [vmem:[%s333_s1 + $0x8] sm:$0xff] }
   0x3   :  { %209 = vmatprep.subr.mxu0 %v256_v1  ;;  %221 = vmatprep.subr.mxu1 %v256_v1 }
   0x4   :  { %210 = vmatpush3.msra.mxu0 %v25_v2  ;;  %223 = vmatpush3.msra.mxu1 %v25_v2 }
   0x5   :  { %11 = vsyncpa [#allocation4], 0  ;;  %vm257_vm2 = vmmov 0   ;;  %v27_v5 = vld [vmem:[%s334_s2] sm:$0xff]  ;;  %v29_v6 = vld [vmem:[%s334_s2 + $0x10] sm:$0xf]  ;;  %v174_v42 = vstv %s336_s4 }
   0x6   :  { %211 = vmatprep.mubr.msk.f32.mxu0 %vm257_vm2, %v256_v1  ;;  %214 = vmatprep.mubr.msk.f32.mxu1 %vm257_vm2, %v256_v1  ;;  %v24_v7 = vld [vmem:[%s333_s1 + $0x10] sm:$0xf]  ;;  %v258_v8 = vmov 0   ;;  %v28_v9 = vld [vmem:[%s334_s2 + $0x8] sm:$0xff]  ;;  %v142_v10 = vld [vmem:[%s335_s3] sm:$0xff]  ;;  %vm164_vm3 = vcmask 1043456  }
   0x7   :  { %212 = vmatmul.mubr.msk.f32.vlgmr.msra.gmra.mxu0 %vm45_vm1, %v22_v3  ;;  %215 = vmatmul.mubr.msk.f32.vlgmr.msra.gmra.mxu1 %vm45_vm1, %v23_v4  ;;  %v143_v11 = vld [vmem:[%s335_s3 + $0x8] sm:$0xff]  ;;  %v144_v12 = vld [vmem:[%s335_s3 + $0x10] sm:$0xf]  ;;  %s259_s13 = smov [#allocation3]  }
   0x8   :  { %217 = vmatprep.mubr.msk.f32.mxu1 %vm257_vm2, %v256_v1  ;;  %228 = vset.pattern.permute.xlu0 %v258_v8  ;;  %s189_s14 = sshll.u32 %s259_s13, 4  ;;  %s190_s14 = int_to_ptr.vmem [resolvable:$true] %s189_s14 }
   0x9   :  { %229 = vset.pattern.permute.xlu1 %v258_v8  ;;  %32 = vperm.xlu0 %228, %v27_v5   ;;  %s234_s15 = scalar_lea.vmem %s190_s14, 16  ;;  %s238_s16 = scalar_lea.vmem %s190_s14, 32 }
   0xa   :  { %42 = vperm.xlu1 %229, %v29_v6   ;;  %p235_p0 = scmp.ne.s32.totalorder %s190_s14, %s234_s15  ;;  %p239_p1 = scmp.lt.s32.totalorder %s190_s14, %s190_s14 }
   0xb   :  { %218 = vmatmul.mubr.msk.f32.gmra.mxu1 %vm45_vm1, %v24_v7  ;;  %p240_p2 = scmp.lt.s32.totalorder %s238_s16, %s234_s15 }
   0xd   :  { %37 = vperm.xlu0 %228, %v28_v9   ;;  %p241_p3 = por %p240_p2, %p239_p1 }
   0xe   :  { %147 = vperm.xlu1 %229, %v142_v10  }
   0xf   :  { %p242_p4 = pnand %p241_p3, %p235_p0 }
  0x11   :  { %152 = vperm.xlu0 %228, %v143_v11  }
  0x12   :  { %157 = vperm.xlu1 %229, %v144_v12  }
  0x84   :  { %v33_v13 = vpop.permute.xlu0 %32 }
  0x85   :  { %v43_v14 = vpop.permute.xlu1 %42 }
  0x88   :  { %v38_v15 = vpop.permute.xlu0 %37 }
  0x89   :  { %v148_v18 = vpop.permute.xlu1 %147 }
  0x8c   :  { %v153_v26 = vpop.permute.xlu0 %152 }
  0x8d   :  { %v158_v32 = vpop.permute.xlu1 %157 }
  0xc7   :  { %v125_v16 = vpop.f32.mrf.mxu0  ;;  %v130_v17 = vpop.f32.mrf.mxu1 }
  0xc8   :  { %v126_v19 = vadd.f32 %v125_v16, %v33_v13  ;;  %v131_v20 = vadd.f32 %v130_v17, %v38_v15 }
  0xc9   :  { %v216_v21 = vpop.f32.mrf.mxu1  ;;  %v213_v22 = vpop.f32.mrf.mxu0 }
  0xca   :  { %v139_v23 = vmax.f32 %v126_v19, 0.0  ;;  %v140_v24 = vmax.f32 %v131_v20, 0.0 }
  0xcb   :  { %v135_v25 = vpop.f32.mrf.mxu1 }
  0xcc   :  { %v136_v27 = vadd.f32 %v135_v25, %v43_v14  ;;  %v160_v28 = vmul.f32 %v148_v18, %v139_v23  ;;  %v161_v29 = vmul.f32 %v153_v26, %v140_v24 }
  0xcd   :  { %v219_v30 = vpop.f32.mrf.mxu1 }
  0xce   :  { %v141_v31 = vmax.f32 %v136_v27, 0.0  ;;  %v163_v34 = vadd.f32 %v161_v29, %v160_v28 }
  0xd0   :  { %v162_v33 = vmul.f32 %v158_v32, %v141_v31 }
  0xd2   :  { %v165_v35 = vsel %vm164_vm3, %v162_v33, 0.0 }
  0xd3   :  { %v166_v36 = vadd.f32 %v165_v35, %v163_v34 }
  0xd5   :  { %v167_v37 = vrot.slane %v166_v36, 4 }
  0xd7   :  { %v168_v38 = vadd.f32 %v167_v37, %v166_v36 }
  0xd9   :  { %v169_v39 = vrot.slane %v168_v38, 2 }
  0xdb   :  { %v170_v40 = vadd.f32 %v169_v39, %v168_v38 }
  0xdd   :  { %v171_v41 = vrot.slane %v170_v40, 1 }
  0xdf   :  { %v172_v43 = vadd.f32 %v171_v41, %v170_v40 }
  0xe1   :  { %v175_v44 = vadd.f32 %v174_v42, %v172_v43 }
  0xe3   :  { %v201_v45 = vmul.f32 -1.442695, %v175_v44 }
  0xe5   :  { %230 = vpow2.f32 %v201_v45 }
  0xf2   :  { %v231_v46 = vpop.eup %230 }
  0xf3   :  { %v179_v47 = vadd.f32 1.0, %v231_v46 }
  0xf5   :  { %232 = vrcp.f32 %v179_v47 }
 0x102   :  { %v233_v48 = vpop.eup %232 }
 0x103   :  { %182 = vst [vmem:[#allocation3] sm:$0x1] %v233_v48 }
 0x104   :  { %245 = shalt.err (!%p242_p4)
}
 0x105   :  { %192 = dma.vmem_to_hbm [thread:$0]  %s190_s14, 16, %s337_s5, [#allocation4]  }
 0x106   :  { %254 = dma.done.wait [#allocation4], 16  }
 0x107   :  { %255 = vsyncadd [#allocation4], 4294967280 }
 0x108   :  { %196 = vsyncpa [#allocation4], 1 }

</bundles_post_ra>
